<compile_context>
chip_gen: v5e
topology: v5e:2x2
jax: 0.10.0
libtpu: 0.0.40
codegen_flags: <defaults>
</compile_context>

<pallas_src>
import jax
import jax.numpy as jnp
from jax import lax
from jax.experimental import pallas as pl
from jax.experimental.pallas import tpu as pltpu


def _round_up(x, m):
    return ((x + m - 1) // m) * m


def _make_attention_kernel(rc, n_chunks):
    """Kernel over one (tb, S, H) batch tile, processed in `n_chunks` chunks
    of `rc` rows each (rc * n_chunks == tb)."""

    def kernel(x_ref, w_ref, b_ref, ctx_ref, wts_ref):
        # x_ref:   (tb, S, H)  batch tile (input dtype)
        # w_ref:   (1, H)      Linear(H, 1) weight, VMEM-resident
        # b_ref:   (1,)        Linear bias (SMEM scalar, f32)
        # ctx_ref: (tb, H)     context output
        # wts_ref: (tb, S)     attention weights (lane-dense; wrapper adds
        #                      the trailing size-1 dim)
        w = w_ref[...].astype(jnp.float32)          # (1, H)
        b = b_ref[0]

        def body(x):                                 # x: (rows, S, H) f32
            # Linear(H -> 1): VPU broadcast-multiply + lane reduce over H.
            logits = jnp.sum(x * w[None, :, :], axis=-1) + b     # (rows, S)
            scores = jnp.tanh(logits)
            # softmax over the sequence axis (torch dim=1)
            m = jnp.max(scores, axis=1, keepdims=True)
            e = jnp.exp(scores - m)
            denom = jnp.sum(e, axis=1, keepdims=True)
            wts = e * pl.reciprocal(denom, approx=True)          # (rows, S)
            ctx = jnp.sum(wts[:, :, None] * x, axis=1)           # (rows, H)
            return ctx, wts

        if n_chunks == 1:
            ctx, wts = body(x_ref[...].astype(jnp.float32))
            ctx_ref[...] = ctx.astype(ctx_ref.dtype)
            wts_ref[...] = wts.astype(wts_ref.dtype)
        else:
            def chunk(c, carry):
                r0 = pl.multiple_of(c * rc, rc)
                ctx, wts = body(x_ref[pl.ds(r0, rc)].astype(jnp.float32))
                ctx_ref[pl.ds(r0, rc), :] = ctx.astype(ctx_ref.dtype)
                wts_ref[pl.ds(r0, rc), :] = wts.astype(wts_ref.dtype)
                return carry

            lax.fori_loop(0, n_chunks, chunk, 0, unroll=n_chunks <= 8)

    return kernel


def _choose_tiling(B, S, H, itemsize, *, block_b=None, row_chunk=None):
    """Pick (batch tile tb, inner row chunk rc) with honest VMEM accounting."""
    # Sublane granule for this dtype (f32: 8, bf16: 16) — keeps dynamic
    # sublane store offsets tile-aligned.
    gran = 8 * max(1, 4 // max(itemsize, 1))
    s_pad = _round_up(S, gran)
    h_pad = _round_up(H, 128)

    # Inner row chunk: bound the per-chunk f32 working set (~128 KiB) so
    # temporaries stay near the vreg file instead of tile-sized f32 spills.
    if row_chunk is None:
        rc = (128 << 10) // max(_round_up(S, 8) * h_pad * 4, 1)
        rc = max(gran, min(256, (rc // gran) * gran))
    else:
        rc = max(1, row_chunk)

    if block_b is None:
        # Per-batch-row VMEM cost, counting double buffers and the padded
        # (sublane, 128-lane) VMEM layout of each block.
        per_row = (2 * s_pad * h_pad * itemsize            # x block, 2x DB
                   + 2 * h_pad * itemsize                  # ctx block, 2x DB
                   + 2 * _round_up(S, 128) * itemsize)     # wts block, 2x DB
        budget = 18 << 20   # headroom under the explicit 32 MiB vmem limit
        tb = max(rc, (budget // per_row) // rc * rc)
        # Keep ~4 grid steps for non-trivial inputs: the pipeline needs >=2-3
        # steps to hide DMA, and an even-ish step count keeps both v7x
        # TensorCores busy.
        if B * S * H * itemsize > (2 << 20):
            tb = min(tb, max(rc, (-(-B // 4) // rc) * rc))
    else:
        tb = block_b

    tb = min(tb, B)
    rc = min(rc, tb)
    tb = max(rc, (tb // rc) * rc)
    return tb, rc


def _attention_call(x, w2d, b1d, *, tb, rc, nb):
    """One pallas_call covering the first nb*tb rows of x."""
    _, S, H = x.shape
    rows = nb * tb
    kernel = _make_attention_kernel(rc, tb // rc)
    return pl.pallas_call(
        kernel,
        out_shape=(
            jax.ShapeDtypeStruct((rows, H), x.dtype),
            jax.ShapeDtypeStruct((rows, S), x.dtype),
        ),
        grid_spec=pltpu.PrefetchScalarGridSpec(
            num_scalar_prefetch=0,
            grid=(nb,),
            in_specs=[
                pl.BlockSpec((tb, S, H), lambda i: (i, 0, 0)),
                # (1, H) linear weight: whole array resident in VMEM for the
                # entire grid — no per-step DMA / double buffer.
                pl.BlockSpec(memory_space=pltpu.MemorySpace.VMEM),
                # (1,) bias scalar in SMEM.
                pl.BlockSpec(memory_space=pltpu.MemorySpace.SMEM),
            ],
            out_specs=[
                pl.BlockSpec((tb, H), lambda i: (i, 0)),
                pl.BlockSpec((tb, S), lambda i: (i, 0)),
            ],
        ),
        compiler_params=pltpu.CompilerParams(
            dimension_semantics=("parallel",),
            vmem_limit_bytes=32 * 1024 * 1024,
        ),
    )(x, w2d, b1d)


def attention_forward(lstm_output, weight, bias, *, block_b=None, row_chunk=None):
    """Matches PyTorch Attention.forward.

    lstm_output: (B, S, H); weight: (1, H); bias: (1,) — nn.Linear(H, 1) params.
    Returns (context (B, H), weights (B, S, 1)); output dtype follows the input
    dtype (feed bf16 lstm_output on v6e/v7x to halve HBM read traffic).
    """
    B, S, H = lstm_output.shape
    w2d = weight.reshape(1, H)
    b1d = bias.reshape(1).astype(jnp.float32)

    tb, rc = _choose_tiling(B, S, H, lstm_output.dtype.itemsize,
                            block_b=block_b, row_chunk=row_chunk)
    nb = B // tb
    b_main = nb * tb

    # Main call reads the ORIGINAL array in place; the grid only touches the
    # first b_main rows (no jnp.pad / full-array copy for ragged batches).
    ctx, wts = _attention_call(lstm_output, w2d, b1d, tb=tb, rc=rc, nb=nb)

    rem = B - b_main
    if rem:
        # Tiny tail call: only the remaining (< tb) rows are re-materialized.
        ctx_t, wts_t = _attention_call(lstm_output[b_main:], w2d, b1d,
                                       tb=rem, rc=rem, nb=1)
        ctx = jnp.concatenate([ctx, ctx_t], axis=0)
        wts = jnp.concatenate([wts, wts_t], axis=0)

    return ctx, wts.reshape(B, S, 1)


def _reference(lstm_output, weight, bias):
    # Pure-JAX (f32) reference of the PyTorch forward.
    x = lstm_output.astype(jnp.float32)
    logits = jnp.einsum("bsh,oh->bso", x, weight.astype(jnp.float32))
    logits = logits + bias.astype(jnp.float32)
    w = jnp.tanh(logits)
    w = jax.nn.softmax(w, axis=1)
    ctx = jnp.sum(w * x, axis=1)
    return ctx, w


if __name__ == "__main__":
    B, S, H = 2, 8, 32
    key = jax.random.PRNGKey(0)
    kx, kw, kb = jax.random.split(key, 3)

    lstm_output = jax.random.normal(kx, (B, S, H), dtype=jnp.float32)
    # Deterministic "Linear(hidden_dim, 1)" parameters (synthetic init).
    bound = 1.0 / (H ** 0.5)
    weight = jax.random.uniform(kw, (1, H), jnp.float32, -bound, bound)
    bias = jax.random.uniform(kb, (1,), jnp.float32, -bound, bound)

    # 1) Base case: single block, single chunk.
    ctx, wts = attention_forward(lstm_output, weight, bias)
    jax.block_until_ready((ctx, wts))
    ctx_ref, wts_ref = _reference(lstm_output, weight, bias)
    assert ctx.shape == (B, H) and wts.shape == (B, S, 1)
    # approx=True reciprocal -> slightly looser tolerance than pure f32.
    assert jnp.allclose(ctx, ctx_ref, atol=2e-3, rtol=2e-3)
    assert jnp.allclose(wts, wts_ref, atol=2e-3, rtol=2e-3)

    # 2) Ragged batch: main grid of 2 blocks + small tail call (no input pad).
    B2 = 20
    x2 = jax.random.normal(jax.random.PRNGKey(1), (B2, S, H), dtype=jnp.float32)
    ctx2, wts2 = attention_forward(x2, weight, bias, block_b=8)
    jax.block_until_ready((ctx2, wts2))
    ctx2_ref, wts2_ref = _reference(x2, weight, bias)
    assert ctx2.shape == (B2, H) and wts2.shape == (B2, S, 1)
    assert jnp.allclose(ctx2, ctx2_ref, atol=2e-3, rtol=2e-3)
    assert jnp.allclose(wts2, wts2_ref, atol=2e-3, rtol=2e-3)

    # 3) In-kernel chunked path: 12 row-chunks via the fori_loop (non-unrolled).
    B3 = 96
    x3 = jax.random.normal(jax.random.PRNGKey(2), (B3, S, H), dtype=jnp.float32)
    ctx3, wts3 = attention_forward(x3, weight, bias, block_b=96, row_chunk=8)
    jax.block_until_ready((ctx3, wts3))
    ctx3_ref, wts3_ref = _reference(x3, weight, bias)
    assert jnp.allclose(ctx3, ctx3_ref, atol=2e-3, rtol=2e-3)
    assert jnp.allclose(wts3, wts3_ref, atol=2e-3, rtol=2e-3)

    # 4) bf16 input path (halved HBM read traffic on v6e/v7x); looser tolerance.
    B4 = 16
    x4 = jax.random.normal(jax.random.PRNGKey(3), (B4, S, H),
                           dtype=jnp.float32).astype(jnp.bfloat16)
    ctx4, wts4 = attention_forward(x4, weight, bias)
    jax.block_until_ready((ctx4, wts4))
    ctx4_ref, wts4_ref = _reference(x4, weight, bias)
    assert ctx4.dtype == jnp.bfloat16
    assert jnp.allclose(ctx4.astype(jnp.float32), ctx4_ref, atol=2e-2, rtol=2e-2)
    assert jnp.allclose(wts4.astype(jnp.float32), wts4_ref, atol=2e-2, rtol=2e-2)

    print("KERNEL_OK")
</pallas_src>

<mosaic_0001>
module attributes {stable_mosaic.version = 11 : i64} {
  func.func @kernel(%arg0: i32, %arg1: memref<2x8x32xf32, #tpu.memory_space<vmem>>, %arg2: memref<1x32xf32, #tpu.memory_space<vmem>>, %arg3: memref<1xf32, #tpu.memory_space<smem>>, %arg4: memref<2x32xf32, #tpu.memory_space<vmem>>, %arg5: memref<2x8xf32, #tpu.memory_space<vmem>>) attributes {dimension_semantics = [#tpu.dimension_semantics<parallel>], iteration_bounds = array<i64: 1>, scalar_prefetch = 0 : i64, scratch_operands = 0 : i64, tpu.core_type = #tpu.core_type<tc>, window_params = [{transform_indices = @transform_0, window_bounds = array<i64: 2, 8, 32>}, {pipeline_mode = #tpu.pipeline_mode<synchronous>, transform_indices = @transform_1, window_bounds = array<i64: 1, 32>}, {transform_indices = @transform_2, window_bounds = array<i64: 1>}, {transform_indices = @transform_3, window_bounds = array<i64: 2, 32>}, {transform_indices = @transform_4, window_bounds = array<i64: 2, 8>}]} {
    %c0 = arith.constant 0 : index
    %c0_0 = arith.constant 0 : index
    %0 = vector.load %arg2[%c0, %c0_0] : memref<1x32xf32, #tpu.memory_space<vmem>>, vector<1x32xf32>
    %c0_1 = arith.constant 0 : index
    %1 = memref.load %arg3[%c0_1] : memref<1xf32, #tpu.memory_space<smem>>
    %c0_2 = arith.constant 0 : index
    %c0_3 = arith.constant 0 : index
    %c0_4 = arith.constant 0 : index
    %2 = vector.load %arg1[%c0_2, %c0_3, %c0_4] : memref<2x8x32xf32, #tpu.memory_space<vmem>>, vector<2x8x32xf32>
    %3 = vector.shape_cast %0 : vector<1x32xf32> to vector<1x1x32xf32>
    %4 = vector.broadcast %3 : vector<1x1x32xf32> to vector<2x8x32xf32>
    %5 = arith.mulf %2, %4 : vector<2x8x32xf32>
    %cst = arith.constant dense<0.000000e+00> : vector<2x8xf32>
    %6 = vector.multi_reduction <add>, %5, %cst [2] : vector<2x8x32xf32> to vector<2x8xf32>
    %7 = vector.broadcast %1 : f32 to vector<2x8xf32>
    %8 = arith.addf %6, %7 : vector<2x8xf32>
    %9 = math.tanh %8 : vector<2x8xf32>
    %cst_5 = arith.constant dense<0xFF800000> : vector<2xf32>
    %10 = vector.multi_reduction <maximumf>, %9, %cst_5 [1] : vector<2x8xf32> to vector<2xf32>
    %11 = vector.shape_cast %10 : vector<2xf32> to vector<2x1xf32>
    %12 = vector.broadcast %11 : vector<2x1xf32> to vector<2x8xf32>
    %13 = arith.subf %9, %12 : vector<2x8xf32>
    %14 = math.exp %13 : vector<2x8xf32>
    %cst_6 = arith.constant dense<0.000000e+00> : vector<2xf32>
    %15 = vector.multi_reduction <add>, %14, %cst_6 [1] : vector<2x8xf32> to vector<2xf32>
    %16 = vector.shape_cast %15 : vector<2xf32> to vector<2x1xf32>
    %17 = tpu.reciprocal %16 {approx = true} : vector<2x1xf32> -> vector<2x1xf32>
    %18 = vector.broadcast %17 : vector<2x1xf32> to vector<2x8xf32>
    %19 = arith.mulf %14, %18 : vector<2x8xf32>
    %20 = vector.shape_cast %19 : vector<2x8xf32> to vector<2x8x1xf32>
    %21 = vector.broadcast %20 : vector<2x8x1xf32> to vector<2x8x32xf32>
    %22 = arith.mulf %21, %2 : vector<2x8x32xf32>
    %cst_7 = arith.constant dense<0.000000e+00> : vector<2x32xf32>
    %23 = vector.multi_reduction <add>, %22, %cst_7 [1] : vector<2x8x32xf32> to vector<2x32xf32>
    %c0_8 = arith.constant 0 : index
    %c0_9 = arith.constant 0 : index
    %24 = vector.load %arg4[%c0_8, %c0_9] : memref<2x32xf32, #tpu.memory_space<vmem>>, vector<2x32xf32>
    tpu.vector_store %arg4[%c0_8, %c0_9], %23 {strides = array<i32>} : memref<2x32xf32, #tpu.memory_space<vmem>>, vector<2x32xf32>,
    %c0_10 = arith.constant 0 : index
    %c0_11 = arith.constant 0 : index
    %25 = vector.load %arg5[%c0_10, %c0_11] : memref<2x8xf32, #tpu.memory_space<vmem>>, vector<2x8xf32>
    tpu.vector_store %arg5[%c0_10, %c0_11], %19 {strides = array<i32>} : memref<2x8xf32, #tpu.memory_space<vmem>>, vector<2x8xf32>,
    return
  }
  func.func @transform_0(%arg0: i32) -> (i32, i32, i32) {
    %c0_i32 = arith.constant 0 : i32
    %c0_i32_0 = arith.constant 0 : i32
    %c0_i32_1 = arith.constant 0 : i32
    return %arg0, %c0_i32, %c0_i32_0 : i32, i32, i32
  }
  func.func @transform_1(%arg0: i32) -> (i32, i32) {
    %c0_i32 = arith.constant 0 : i32
    %c0_i32_0 = arith.constant 0 : i32
    %c0_i32_1 = arith.constant 0 : i32
    return %c0_i32, %c0_i32_0 : i32, i32
  }
  func.func @transform_2(%arg0: i32) -> i32 {
    %c0_i32 = arith.constant 0 : i32
    %c0_i32_0 = arith.constant 0 : i32
    return %c0_i32 : i32
  }
  func.func @transform_3(%arg0: i32) -> (i32, i32) {
    %c0_i32 = arith.constant 0 : i32
    %c0_i32_0 = arith.constant 0 : i32
    return %arg0, %c0_i32 : i32, i32
  }
  func.func @transform_4(%arg0: i32) -> (i32, i32) {
    %c0_i32 = arith.constant 0 : i32
    %c0_i32_0 = arith.constant 0 : i32
    return %arg0, %c0_i32 : i32, i32
  }
}

</mosaic_0001>

<bundles_post_ra>
// kernel: tpu_custom_call.1
= control target key start
LH: loop header
LB: loop body
LE: loop exit
PB: predicated region body
PF: predicated region fallthrough
CT: control target
= control target key end

     0   :  { %11 = vsyncpa [#allocation4], 0  ;;  %s332_s0 = inlined_call_operand.hbm [shape: f32[2,8,32], index: 0, kind: input, shape index: {}]   ;;  %s333_s1 = inlined_call_operand.vmem [shape: f32[1,32], index: 1, kind: input, shape index: {}]   ;;  %s334_s2 = inlined_call_operand.<no memory space> [shape: f32[1], index: 2, kind: input, shape index: {}]   ;;  %s335_s3 = inlined_call_operand.hbm [shape: f32[2,32], index: 3, kind: output, shape index: {0}]   ;;  %s336_s4 = inlined_call_operand.hbm [shape: f32[2,8], index: 4, kind: output, shape index: {1}]  }
   0x1   :  { %12 = vsyncpa [#allocation5], 0 }
   0x2   :  { %13 = vsyncpa [#allocation8], 0  ;;  %s18_s17 = sshll.u32 %s332_s0, 4  ;;  %s271_s18 = smov [#allocation3]   ;;  %s19_s17 = int_to_ptr.hbm [resolvable:$true] %s18_s17 }
   0x3   :  { %s20_s19 = sshll.u32 %s271_s18, 4  ;;  %s272_s20 = smov 128   ;;  %s21_s19 = int_to_ptr.vmem [resolvable:$true] %s20_s19 }
   0x4   :  { %s273_s21 = smov 8  }
   0x5   :  { %26 = dma.hbm_to_vmem [thread:$0]  %s19_s17, 256, %s21_s19, [#allocation4], %s272_s20, %s272_s20, %s273_s21  }
   0x6   :  { %265 = dma.done.wait [#allocation4], 256  }
   0x7   :  { %266 = vsyncadd [#allocation4], 4294967040  ;;  %v305_v0 = vld [vmem:[#allocation3] sm:$0xff]  ;;  %vm44_vm0 = vcmask 261120   ;;  %v38_v3 = vld [vmem:[#allocation3 + $0x8] sm:$0xff]  ;;  %v51_v8 = vstv %s334_s2  ;;  %v58_v12 = vlaneseq  ;;  %vm62_vm1 = vcmask 1041409  }
   0x8   :  { %v182_v1 = vld [vmem:[%s333_s1] ss:$0 sm:$0xff]  ;;  %vm65_vm2 = vcmask 58368   ;;  %v274_v20 = vmov 0   ;;  %s275_s1 = smov [#allocation7]   ;;  %s158_s27 = sshll.u32 %s336_s4, 4  ;;  %s159_s27 = int_to_ptr.hbm [resolvable:$true] %s158_s27 }
   0x9   :  { %v42_v2 = vmul.f32 %v182_v1, %v305_v0  ;;  %v43_v5 = vmul.f32 %v182_v1, %v38_v3  ;;  %v59_v13 = vand.u32 127, %v58_v12  ;;  %180 = vset.pattern.permute.xlu2 %v274_v20  ;;  %179 = vset.pattern.permute.xlu1 %v274_v20  ;;  %s156_s2 = sshll.u32 %s275_s1, 4  ;;  %s276_s4 = smov [#allocation6]   ;;  %vm133_vm3 = vcmask 254976   ;;  %s157_s2 = int_to_ptr.vmem [resolvable:$true] %s156_s2 }
   0xa   :  { %181 = vset.pattern.permute.xlu0 %v274_v20  ;;  %s145_s28 = sshll.u32 %s276_s4, 4  ;;  %s147_s5 = sshll.u32 %s335_s3, 4  ;;  %s146_s28 = int_to_ptr.vmem [resolvable:$true] %s145_s28  ;;  %s148_s5 = int_to_ptr.hbm [resolvable:$true] %s147_s5 }
   0xb   :  { %v45_v4 = vsel %vm44_vm0, %v42_v2, 0.0  ;;  %v48_v6 = vsel %vm44_vm0, %v43_v5, 0.0 }
   0xc   :  { %46 = vadd.xlane.f32.xlu0 %v45_v4 }
  0x14   :  { %49 = vadd.xlane.f32.xlu0 %v48_v6 }
  0x7f   :  { %v47_v7 = vpop.xlane.xlu0 %46 }
  0x80   :  { %v52_v9 = vadd.f32 %v51_v8, %v47_v7 }
  0x82   :  { %183 = vtanh.f32 %v52_v9 }
  0x87   :  { %v50_v10 = vpop.xlane.xlu0 %49 }
  0x88   :  { %v53_v11 = vadd.f32 %v51_v8, %v50_v10  ;;  %v184_v14 = vpop.eup %183 }
  0x89   :  { %v60_v16 = vperm.slane %v184_v14, %v59_v13 }
  0x8a   :  { %185 = vtanh.f32 %v53_v11 }
  0x90   :  { %v186_v15 = vpop.eup %185 }
  0x91   :  { %v61_v17 = vperm.slane %v186_v15, %v59_v13 }
  0x93   :  { %v63_v18 = vsel %vm62_vm1, %v61_v17, %v60_v16 }
  0x94   :  { %v66_v19 = vsel %vm65_vm2, %v63_v18, -inf }
  0x95   :  { %67 = vmax.xlane.f32.xlu1 %v66_v19 }
 0x108   :  { %v68_v21 = vpop.xlane.xlu1 %67 }
 0x109   :  { %v70_v22 = vperm.slane %v68_v21, 0  ;;  %v71_v23 = vperm.slane %v68_v21, 1 }
 0x10b   :  { %v74_v24 = vsub.f32 %v184_v14, %v70_v22  ;;  %v75_v25 = vsub.f32 %v186_v15, %v71_v23 }
 0x10d   :  { %v76_v26 = vmul.f32 1.442695, %v74_v24  ;;  %v78_v27 = vmul.f32 1.442695, %v75_v25 }
 0x10f   :  { %187 = vpow2.f32 %v76_v26 }
 0x110   :  { %189 = vpow2.f32 %v78_v27 }
 0x115   :  { %v188_v28 = vpop.eup %187 }
 0x116   :  { %v190_v29 = vpop.eup %189  ;;  %83 = vperm.xlu1 %179, %v188_v28  }
 0x117   :  { %86 = vperm.xlu2 %180, %v190_v29  }
 0x171   :  { %v87_v30 = vpop.permute.xlu2 %86 }
 0x172   :  { %v89_v32 = vperm.slane %v87_v30, %v59_v13 }
 0x188   :  { %v84_v31 = vpop.permute.xlu1 %83 }
 0x189   :  { %v88_v33 = vperm.slane %v84_v31, %v59_v13 }
 0x18b   :  { %v90_v34 = vsel %vm62_vm1, %v89_v32, %v88_v33 }
 0x18c   :  { %v92_v35 = vsel %vm65_vm2, %v90_v34, 0.0 }
 0x18d   :  { %93 = vadd.xlane.f32.xlu2 %v92_v35 }
 0x200   :  { %v94_v36 = vpop.xlane.xlu2 %93 }
 0x201   :  { %191 = vrcp.f32 %v94_v36 }
 0x207   :  { %v192_v37 = vpop.eup %191 }
 0x208   :  { %v98_v38 = vperm.slane %v192_v37, 1  ;;  %v97_v39 = vperm.slane %v192_v37, 0 }
 0x20a   :  { %v102_v40 = vmul.f32 %v190_v29, %v98_v38  ;;  %v101_v41 = vmul.f32 %v188_v28, %v97_v39 }
 0x20c   :  { %110 = vperm.xlu1 %179, %v102_v40   ;;  %105 = vperm.xlu0 %181, %v101_v41  }
 0x27e   :  { %v111_v42 = vpop.permute.xlu1 %110  ;;  %v106_v43 = vpop.permute.xlu0 %105 }
 0x27f   :  { %v114_v44 = vmul.f32 %v111_v42, %v38_v3  ;;  %v136_v45 = vperm.slane %v111_v42, %v59_v13  ;;  %v113_v46 = vmul.f32 %v106_v43, %v305_v0  ;;  %v135_v47 = vperm.slane %v106_v43, %v59_v13 }
 0x281   :  { %v122_v48 = vsel %vm44_vm0, %v114_v44, 0.0  ;;  %v115_v49 = vsel %vm44_vm0, %v113_v46, 0.0  ;;  %v137_v50 = vsel %vm62_vm1, %v136_v45, %v135_v47 }
 0x282   :  { %v123_v51 = vrot.slane %v122_v48, 4  ;;  %v116_v52 = vrot.slane %v115_v49, 4  ;;  %139 = vst.msk [vmem:[#allocation7] sm:$0x3] %vm65_vm2, %v137_v50 }
 0x283   :  { %161 = dma.vmem_to_hbm [thread:$0]  %s157_s2, 32, %s159_s27, [#allocation8]  }
 0x284   :  { %v124_v53 = vadd.f32 %v123_v51, %v122_v48  ;;  %v117_v54 = vadd.f32 %v116_v52, %v115_v49 }
 0x286   :  { %v125_v55 = vrot.slane %v124_v53, 2  ;;  %v118_v56 = vrot.slane %v117_v54, 2 }
 0x288   :  { %v126_v57 = vadd.f32 %v125_v55, %v124_v53  ;;  %v119_v58 = vadd.f32 %v118_v56, %v117_v54 }
 0x28a   :  { %v127_v59 = vrot.slane %v126_v57, 1  ;;  %v120_v60 = vrot.slane %v119_v58, 1 }
 0x28c   :  { %v128_v61 = vadd.f32 %v127_v59, %v126_v57  ;;  %v121_v62 = vadd.f32 %v120_v60, %v119_v58 }
 0x28e   :  { %v131_v63 = vsel %vm62_vm1, %v128_v61, %v121_v62 }
 0x28f   :  { %134 = vst.msk [vmem:[#allocation6] sm:$0x3] %vm133_vm3, %v131_v63 }
 0x290   :  { %150 = dma.vmem_to_hbm [thread:$0]  %s146_s28, 32, %s148_s5, [#allocation5]  }
 0x291   :  { %267 = dma.done.wait [#allocation5], 32  }
 0x292   :  { %268 = vsyncadd [#allocation5], 4294967264 }
 0x293   :  { %269 = dma.done.wait [#allocation8], 32  }
 0x294   :  { %270 = vsyncadd [#allocation8], 4294967264 }
 0x295   :  { %170 = vsyncpa [#allocation4], 1 }
 0x296   :  { %171 = vsyncpa [#allocation5], 1 }
 0x297   :  { %172 = vsyncpa [#allocation8], 1 }

</bundles_post_ra>
